<compile_context>
chip_gen: v7x
topology: tpu7x:2x2x1
jax: 0.10.0
libtpu: 0.0.40
codegen_flags: <defaults>
</compile_context>

<pallas_src>
import functools
import math

import jax
import jax.numpy as jnp
from jax.experimental import pallas as pl
from jax.experimental.pallas import tpu as pltpu


def _round_up(x, m):
    return ((x + m - 1) // m) * m


def _vmem_capacity():
    try:
        return int(pltpu.get_tpu_info().vmem_capacity_bytes)
    except Exception:
        return 128 * 1024 * 1024


# ---------------------------------------------------------------------------
# Kernel 1: per-batch K/V projection (with the *query* projection, faithful to
# the module).  Keys are emitted already transposed to (Dp, Lkp) bf16 so the
# attention kernel's QK^T is a standard MXU contraction; values are bf16 too.
# ---------------------------------------------------------------------------
def _kv_project_kernel(k_ref, v_ref, wq_ref, bq_ref, kt_ref, vp_ref):
    """k_ref/v_ref: (1, TK, Dp) bf16; wq_ref: (Dp, Dp) bf16 (in,out);
    bq_ref: (1, Dp) f32; kt_ref: (1, Dp, TK) bf16; vp_ref: (1, TK, Dp) bf16."""
    w = wq_ref[...]
    b = bq_ref[...]
    kp = jnp.dot(k_ref[0], w, preferred_element_type=jnp.float32) + b   # (TK, Dp)
    vp = jnp.dot(v_ref[0], w, preferred_element_type=jnp.float32) + b   # (TK, Dp)
    kt_ref[0] = kp.T.astype(jnp.bfloat16)                               # (Dp, TK)
    vp_ref[0] = vp.astype(jnp.bfloat16)


def _project_kv(k_p, v_p, wq_t, bq_p):
    B, Lkp, Dp = k_p.shape
    tk = next(c for c in (512, 256, 128) if Lkp % c == 0)
    return pl.pallas_call(
        _kv_project_kernel,
        out_shape=(jax.ShapeDtypeStruct((B, Dp, Lkp), jnp.bfloat16),
                   jax.ShapeDtypeStruct((B, Lkp, Dp), jnp.bfloat16)),
        grid_spec=pltpu.PrefetchScalarGridSpec(
            num_scalar_prefetch=0,
            grid=(B, Lkp // tk),
            in_specs=[
                pl.BlockSpec((1, tk, Dp), lambda b, ki: (b, ki, 0)),   # keys (bf16)
                pl.BlockSpec((1, tk, Dp), lambda b, ki: (b, ki, 0)),   # values (bf16)
                pl.BlockSpec((Dp, Dp), lambda b, ki: (0, 0)),          # wq^T
                pl.BlockSpec((1, Dp), lambda b, ki: (0, 0)),           # bq
            ],
            out_specs=[
                pl.BlockSpec((1, Dp, tk), lambda b, ki: (b, 0, ki)),   # K^T (bf16)
                pl.BlockSpec((1, tk, Dp), lambda b, ki: (b, ki, 0)),   # V   (bf16)
            ],
        ),
        compiler_params=pltpu.CompilerParams(
            dimension_semantics=("parallel", "parallel")),
    )(k_p, v_p, wq_t, bq_p)


# ---------------------------------------------------------------------------
# Kernel 2: attention over one (batch b, query-tile qi) grid step.
# ---------------------------------------------------------------------------
def _attention_kernel(q_ref, kt_ref, v_ref, wq_ref, bq_ref, wo_ref, bo_ref,
                      bias_ref, out_ref, wgt_ref):
    """q_ref: (1, TQ, Dp) bf16 raw query tile
    kt_ref : (1, Dp, Lkp) bf16 projected keys, transposed
    v_ref  : (1, Lkp, Dp) bf16 projected values
    wq_ref / wo_ref: (Dp, Dp) bf16 (transposed, in->out); bq_ref / bo_ref: (1, Dp) f32
    bias_ref: (1, Lkp) f32 additive key-padding mask (0 / -1e30)
    out_ref: (1, TQ, Dp); wgt_ref: (1, TQ, Lkp) (bf16)"""
    # Query projection for this tile (no cross-iteration state).
    q = (jnp.dot(q_ref[0], wq_ref[...], preferred_element_type=jnp.float32)
         + bq_ref[...]).astype(jnp.bfloat16)                           # (TQ, Dp)

    # Scores: plain contraction against pre-transposed projected keys.
    score = jnp.dot(q, kt_ref[0], preferred_element_type=jnp.float32)  # (TQ, Lkp)
    score = score + bias_ref[...]                                       # pad mask

    # Softmax over keys (the reference module applies no 1/sqrt(d) scaling).
    m = jnp.max(score, axis=-1, keepdims=True)
    e = jnp.exp(score - m)
    denom = jnp.sum(e, axis=-1, keepdims=True)
    # Approx reciprocal runs on the EUP slot; weights sum to 1 only to ~1e-3.
    weights = e * pl.reciprocal(denom, approx=True)                     # (TQ, Lkp)

    out = jnp.dot(weights.astype(jnp.bfloat16), v_ref[0],
                  preferred_element_type=jnp.float32)                   # (TQ, Dp)
    out = (jnp.dot(out.astype(jnp.bfloat16), wo_ref[...],
                   preferred_element_type=jnp.float32) + bo_ref[...])

    out_ref[0] = out.astype(out_ref.dtype)
    wgt_ref[0] = weights.astype(wgt_ref.dtype)


def _vmem_bytes(tq, lkp, dp):
    """Rough per-step VMEM footprint (double-buffered blocks + temporaries)."""
    bf16, f32 = 2, 4
    q_in = 2 * tq * dp * bf16
    kt_in = 2 * dp * lkp * bf16
    v_in = 2 * lkp * dp * bf16
    w_in = 2 * 2 * dp * dp * bf16
    b_in = 2 * 2 * 8 * dp * f32 + 2 * 8 * lkp * f32
    out_o = 2 * tq * dp * f32
    wgt_o = 2 * tq * lkp * bf16
    temps = 3 * tq * lkp * f32 + 4 * tq * dp * f32
    return q_in + kt_in + v_in + w_in + b_in + out_o + wgt_o + temps


def _choose_tq(lq_pad8, lkp, dp, budget):
    """Largest query tile (multiple of 8, <= padded Lq) fitting the budget."""
    for cand in (2048, 1024, 512, 256, 128, 64, 32, 16, 8):
        if cand <= lq_pad8 and _vmem_bytes(cand, lkp, dp) <= budget:
            return cand
    return 8


def attention_forward(query, key, value, wq, bq, wo, bo, *, tq=None,
                      weights_dtype=jnp.bfloat16):
    """query: (B, Lq, D); key/value: (B, Lk, D).  wq/wo: nn.Linear weights
    (out, in); bq/bo: (D,).  Returns (output (B, Lq, D) in query.dtype,
    weights (B, Lq, Lk) in `weights_dtype` — bf16 by default to halve HBM
    writeback; pass jnp.float32 for exact-dtype parity with the module)."""
    B, Lq, D = query.shape
    Lk = key.shape[1]
    out_dtype = query.dtype

    # Lane-dense, (8, 128)-aligned padded shapes.
    Dp = _round_up(D, 128)
    Lkp = _round_up(Lk, 128)
    lq8 = _round_up(Lq, 8)

    # Generation-aware VMEM budgets: ~48 MiB limit / 40 MiB tile budget on
    # 64 MiB parts (v7x), ~100 MiB / 92 MiB on 128 MiB parts (v5e/v6e).
    capacity = _vmem_capacity()
    vmem_limit = int(min(capacity - 16 * 1024 * 1024, 100 * 1024 * 1024))
    budget = vmem_limit - 8 * 1024 * 1024

    if tq is None:
        tq = _choose_tq(lq8, Lkp, Dp, budget)
    tq = max(8, _round_up(min(tq, lq8), 8))
    Lqp = _round_up(Lq, tq)

    def pad_to(x, shape):
        pads = [(0, s - d) for d, s in zip(x.shape, shape)]
        return jnp.pad(x, pads) if any(p for _, p in pads) else x

    # bf16 activations/weights into the kernels (f32 MXU accumulation inside).
    q_p = pad_to(query.astype(jnp.bfloat16), (B, Lqp, Dp))
    k_p = pad_to(key.astype(jnp.bfloat16), (B, Lkp, Dp))
    v_p = pad_to(value.astype(jnp.bfloat16), (B, Lkp, Dp))
    wq_t = pad_to(wq.T.astype(jnp.float32), (Dp, Dp)).astype(jnp.bfloat16)
    wo_t = pad_to(wo.T.astype(jnp.float32), (Dp, Dp)).astype(jnp.bfloat16)
    bq_p = pad_to(bq.reshape(1, D).astype(jnp.float32), (1, Dp))
    bo_p = pad_to(bo.reshape(1, D).astype(jnp.float32), (1, Dp))

    # Additive key-padding mask: 0 for real key columns, -1e30 for padding.
    col = jnp.arange(Lkp, dtype=jnp.int32).reshape(1, Lkp)
    bias = jnp.where(col < Lk, 0.0, -1e30).astype(jnp.float32)

    # Hoisted per-batch K/V projection (keys pre-transposed, both bf16).
    kt, vproj = _project_kv(k_p, v_p, wq_t, bq_p)

    est = _vmem_bytes(tq, Lkp, Dp)
    vmem_limit = int(min(max(32 * 1024 * 1024, vmem_limit, int(1.2 * est)),
                         capacity - 8 * 1024 * 1024))

    grid = (B, Lqp // tq)

    out_p, wgt_p = pl.pallas_call(
        _attention_kernel,
        out_shape=(
            jax.ShapeDtypeStruct((B, Lqp, Dp), out_dtype),
            jax.ShapeDtypeStruct((B, Lqp, Lkp), weights_dtype),
        ),
        grid_spec=pltpu.PrefetchScalarGridSpec(
            num_scalar_prefetch=0,
            grid=grid,
            in_specs=[
                pl.BlockSpec((1, tq, Dp), lambda b, qi: (b, qi, 0)),    # query tile (bf16)
                pl.BlockSpec((1, Dp, Lkp), lambda b, qi: (b, 0, 0)),    # projected K^T (bf16)
                pl.BlockSpec((1, Lkp, Dp), lambda b, qi: (b, 0, 0)),    # projected V (bf16)
                pl.BlockSpec((Dp, Dp), lambda b, qi: (0, 0)),           # wq^T (bf16)
                pl.BlockSpec((1, Dp), lambda b, qi: (0, 0)),            # bq
                pl.BlockSpec((Dp, Dp), lambda b, qi: (0, 0)),           # wo^T (bf16)
                pl.BlockSpec((1, Dp), lambda b, qi: (0, 0)),            # bo
                pl.BlockSpec((1, Lkp), lambda b, qi: (0, 0)),           # key-pad bias
            ],
            out_specs=[
                pl.BlockSpec((1, tq, Dp), lambda b, qi: (b, qi, 0)),
                pl.BlockSpec((1, tq, Lkp), lambda b, qi: (b, qi, 0)),
            ],
        ),
        compiler_params=pltpu.CompilerParams(
            dimension_semantics=("parallel", "parallel"),
            vmem_limit_bytes=vmem_limit),
    )(q_p, kt, vproj, wq_t, bq_p, wo_t, bo_p, bias)

    return out_p[:, :Lq, :D], wgt_p[:, :Lq, :Lk]


def _reference(query, key, value, wq, bq, wo, bo):
    # Pure-JAX f32 reference mirroring the PyTorch forward (eval mode).
    queries = query @ wq.T + bq
    keys = key @ wq.T + bq
    values = value @ wq.T + bq
    score = jnp.einsum("bqd,bkd->bqk", queries, keys)
    weights = jax.nn.softmax(score, axis=-1)
    out = jnp.einsum("bqk,bkd->bqd", weights, values)
    out = out @ wo.T + bo
    return out, weights


if __name__ == "__main__":
    B, Lq, Lk, D = 2, 8, 8, 32
    key0 = jax.random.PRNGKey(0)
    k_q, k_k, k_v, k_wq, k_bq, k_wo, k_bo = jax.random.split(key0, 7)

    query = jax.random.normal(k_q, (B, Lq, D), dtype=jnp.float32)
    keyx = jax.random.normal(k_k, (B, Lk, D), dtype=jnp.float32)
    value = jax.random.normal(k_v, (B, Lk, D), dtype=jnp.float32)

    # deterministic nn.Linear-style init: U(-1/sqrt(D), 1/sqrt(D))
    bound = 1.0 / math.sqrt(D)
    wq = jax.random.uniform(k_wq, (D, D), minval=-bound, maxval=bound, dtype=jnp.float32)
    bq = jax.random.uniform(k_bq, (D,), minval=-bound, maxval=bound, dtype=jnp.float32)
    wo = jax.random.uniform(k_wo, (D, D), minval=-bound, maxval=bound, dtype=jnp.float32)
    bo = jax.random.uniform(k_bo, (D,), minval=-bound, maxval=bound, dtype=jnp.float32)

    out, weights = attention_forward(query, keyx, value, wq, bq, wo, bo)
    jax.block_until_ready((out, weights))

    ref_out, ref_w = _reference(query, keyx, value, wq, bq, wo, bo)
    assert out.shape == ref_out.shape and weights.shape == ref_w.shape
    # bf16 MXU operands / bf16 inputs + approx reciprocal + bf16 weights
    # writeback -> loose tolerance.
    assert jnp.allclose(out, ref_out, atol=6e-2, rtol=6e-2), (
        "output mismatch: max abs err %f" % float(jnp.max(jnp.abs(out - ref_out))))
    assert jnp.allclose(weights.astype(jnp.float32), ref_w, atol=6e-2, rtol=6e-2), (
        "weights mismatch: max abs err %f"
        % float(jnp.max(jnp.abs(weights.astype(jnp.float32) - ref_w))))

    print("KERNEL_OK")
</pallas_src>

<mosaic_0001>
module attributes {stable_mosaic.version = 11 : i64} {
  func.func @_kv_project_kernel(%arg0: i32, %arg1: i32, %arg2: memref<1x128x128xbf16, #tpu.memory_space<vmem>>, %arg3: memref<1x128x128xbf16, #tpu.memory_space<vmem>>, %arg4: memref<128x128xbf16, #tpu.memory_space<vmem>>, %arg5: memref<1x128xf32, #tpu.memory_space<vmem>>, %arg6: memref<1x128x128xbf16, #tpu.memory_space<vmem>>, %arg7: memref<1x128x128xbf16, #tpu.memory_space<vmem>>) attributes {dimension_semantics = [#tpu.dimension_semantics<parallel>, #tpu.dimension_semantics<parallel>], iteration_bounds = array<i64: 2, 1>, scalar_prefetch = 0 : i64, scratch_operands = 0 : i64, tpu.core_type = #tpu.core_type<tc>, window_params = [{transform_indices = @transform_0, window_bounds = array<i64: 1, 128, 128>}, {transform_indices = @transform_1, window_bounds = array<i64: 1, 128, 128>}, {pipeline_mode = #tpu.pipeline_mode<synchronous>, transform_indices = @transform_2, window_bounds = array<i64: 128, 128>}, {pipeline_mode = #tpu.pipeline_mode<synchronous>, transform_indices = @transform_3, window_bounds = array<i64: 1, 128>}, {transform_indices = @transform_4, window_bounds = array<i64: 1, 128, 128>}, {transform_indices = @transform_5, window_bounds = array<i64: 1, 128, 128>}]} {
    %c0 = arith.constant 0 : index
    %c0_0 = arith.constant 0 : index
    %0 = vector.load %arg4[%c0, %c0_0] : memref<128x128xbf16, #tpu.memory_space<vmem>>, vector<128x128xbf16>
    %c0_1 = arith.constant 0 : index
    %c0_2 = arith.constant 0 : index
    %1 = vector.load %arg5[%c0_1, %c0_2] : memref<1x128xf32, #tpu.memory_space<vmem>>, vector<1x128xf32>
    %c0_3 = arith.constant 0 : index
    %c0_4 = arith.constant 0 : index
    %c0_5 = arith.constant 0 : index
    %2 = vector.load %arg2[%c0_3, %c0_4, %c0_5] : memref<1x128x128xbf16, #tpu.memory_space<vmem>>, vector<1x128x128xbf16>
    %3 = vector.shape_cast %2 : vector<1x128x128xbf16> to vector<128x128xbf16>
    %cst = arith.constant dense<0.000000e+00> : vector<128x128xf32>
    %4 = tpu.matmul %3, %0, %cst {dimension_numbers = #tpu.dot_dimension_numbers<[1], [0], [0], [1], [0, 0, 1, 1], [], []>} : vector<128x128xbf16>, vector<128x128xbf16>, vector<128x128xf32> -> vector<128x128xf32>
    %5 = vector.broadcast %1 : vector<1x128xf32> to vector<128x128xf32>
    %6 = arith.addf %4, %5 : vector<128x128xf32>
    %c0_6 = arith.constant 0 : index
    %c0_7 = arith.constant 0 : index
    %c0_8 = arith.constant 0 : index
    %7 = vector.load %arg3[%c0_6, %c0_7, %c0_8] : memref<1x128x128xbf16, #tpu.memory_space<vmem>>, vector<1x128x128xbf16>
    %8 = vector.shape_cast %7 : vector<1x128x128xbf16> to vector<128x128xbf16>
    %cst_9 = arith.constant dense<0.000000e+00> : vector<128x128xf32>
    %9 = tpu.matmul %8, %0, %cst_9 {dimension_numbers = #tpu.dot_dimension_numbers<[1], [0], [0], [1], [0, 0, 1, 1], [], []>} : vector<128x128xbf16>, vector<128x128xbf16>, vector<128x128xf32> -> vector<128x128xf32>
    %10 = vector.broadcast %1 : vector<1x128xf32> to vector<128x128xf32>
    %11 = arith.addf %9, %10 : vector<128x128xf32>
    %12 = tpu.transpose %6, [1, 0] : vector<128x128xf32> -> vector<128x128xf32>
    %13 = arith.truncf %12 : vector<128x128xf32> to vector<128x128xbf16>
    %c0_10 = arith.constant 0 : index
    %c0_11 = arith.constant 0 : index
    %c0_12 = arith.constant 0 : index
    %14 = vector.load %arg6[%c0_10, %c0_11, %c0_12] : memref<1x128x128xbf16, #tpu.memory_space<vmem>>, vector<1x128x128xbf16>
    %15 = vector.shape_cast %14 : vector<1x128x128xbf16> to vector<128x128xbf16>
    %16 = vector.shape_cast %13 : vector<128x128xbf16> to vector<1x128x128xbf16>
    tpu.vector_store %arg6[%c0_10, %c0_11, %c0_12], %16 {strides = array<i32>} : memref<1x128x128xbf16, #tpu.memory_space<vmem>>, vector<1x128x128xbf16>,
    %17 = arith.truncf %11 : vector<128x128xf32> to vector<128x128xbf16>
    %c0_13 = arith.constant 0 : index
    %c0_14 = arith.constant 0 : index
    %c0_15 = arith.constant 0 : index
    %18 = vector.load %arg7[%c0_13, %c0_14, %c0_15] : memref<1x128x128xbf16, #tpu.memory_space<vmem>>, vector<1x128x128xbf16>
    %19 = vector.shape_cast %18 : vector<1x128x128xbf16> to vector<128x128xbf16>
    %20 = vector.shape_cast %17 : vector<128x128xbf16> to vector<1x128x128xbf16>
    tpu.vector_store %arg7[%c0_13, %c0_14, %c0_15], %20 {strides = array<i32>} : memref<1x128x128xbf16, #tpu.memory_space<vmem>>, vector<1x128x128xbf16>,
    return
  }
  func.func @transform_0(%arg0: i32, %arg1: i32) -> (i32, i32, i32) {
    %c0_i32 = arith.constant 0 : i32
    %c0_i32_0 = arith.constant 0 : i32
    return %arg0, %arg1, %c0_i32 : i32, i32, i32
  }
  func.func @transform_1(%arg0: i32, %arg1: i32) -> (i32, i32, i32) {
    %c0_i32 = arith.constant 0 : i32
    %c0_i32_0 = arith.constant 0 : i32
    return %arg0, %arg1, %c0_i32 : i32, i32, i32
  }
  func.func @transform_2(%arg0: i32, %arg1: i32) -> (i32, i32) {
    %c0_i32 = arith.constant 0 : i32
    %c0_i32_0 = arith.constant 0 : i32
    %c0_i32_1 = arith.constant 0 : i32
    return %c0_i32, %c0_i32_0 : i32, i32
  }
  func.func @transform_3(%arg0: i32, %arg1: i32) -> (i32, i32) {
    %c0_i32 = arith.constant 0 : i32
    %c0_i32_0 = arith.constant 0 : i32
    %c0_i32_1 = arith.constant 0 : i32
    return %c0_i32, %c0_i32_0 : i32, i32
  }
  func.func @transform_4(%arg0: i32, %arg1: i32) -> (i32, i32, i32) {
    %c0_i32 = arith.constant 0 : i32
    %c0_i32_0 = arith.constant 0 : i32
    return %arg0, %c0_i32, %arg1 : i32, i32, i32
  }
  func.func @transform_5(%arg0: i32, %arg1: i32) -> (i32, i32, i32) {
    %c0_i32 = arith.constant 0 : i32
    %c0_i32_0 = arith.constant 0 : i32
    return %arg0, %arg1, %c0_i32 : i32, i32, i32
  }
}

</mosaic_0001>

<bundles_post_ra>
// kernel: tpu_custom_call.1
= control target key start
LH: loop header
LB: loop body
LE: loop exit
PB: predicated region body
PF: predicated region fallthrough
CT: control target
= control target key end

     0   :  { %s2180_s0 = inlined_call_operand.hbm [shape: bf16[2,128,128], index: 0, kind: input, shape index: {}]   ;;  %s2181_s1 = inlined_call_operand.hbm [shape: bf16[2,128,128], index: 1, kind: input, shape index: {}]   ;;  %s2182_s2 = inlined_call_operand.hbm [shape: bf16[128,128], index: 2, kind: input, shape index: {}]   ;;  %s2183_s3 = inlined_call_operand.vmem [shape: f32[1,128], index: 3, kind: input, shape index: {}]   ;;  %s2184_s4 = inlined_call_operand.hbm [shape: bf16[2,128,128], index: 4, kind: output, shape index: {0}]   ;;  %s2185_s5 = inlined_call_operand.hbm [shape: bf16[2,128,128], index: 5, kind: output, shape index: {1}]  }
   0x1   :  { %2195 = sst [smem:[#allocation18_spill]] %s2180_s0 }
   0x2   :  { %2196 = sst [smem:[#allocation19_spill]] %s2182_s2 }
   0x3   :  { %11 = vsyncpa [#allocation3], 0 }
   0x4   :  { %13 = vsyncpa [#allocation3 + $0x1], 0 }
   0x5   :  { %14 = vsyncpa [#allocation6], 0 }
   0x6   :  { %16 = vsyncpa [#allocation6 + $0x1], 0 }
   0x7   :  { %17 = vsyncpa [#allocation4], 0 }
   0x8   :  { %19 = vsyncpa [#allocation4 + $0x1], 0 }
   0x9   :  { %20 = vsyncpa [#allocation10], 0 }
   0xa   :  { %22 = vsyncpa [#allocation10 + $0x1], 0  ;;  %s1785_s18 = smov 0   ;;  %s1787_s19 = smov 0  }
   0xb   :  { %s1789_s20 = smov 0   ;;  %s1791_s21 = smov 0  }
   0xc   :  { %s1793_s22 = smov 0   ;;  %s1795_s23 = smov 0  }
   0xd LB: > { %2197 = sst [smem:[#allocation16_spill]] %s1740_s22  ;;  %s1816_s24 = sadd.s32 4294967295, %s1744_s23   ;;  %s1744_s23 = sphi %s1795_s23, %s28_s23   ;;  %s1740_s22 = sphi %s1793_s22, %s2218_s22   ;;  %s1736_s21 = sphi %s1791_s21, %s2217_s21   ;;  %s1732_s20 = sphi %s1789_s20, %s2221_s20   ;;  %s1728_s19 = sphi %s1787_s19, %s2220_s19   ;;  %s1724_s18 = sphi %s1785_s18, %s2219_s18  }
   0xe   : > { %s1116_s25 = sadd.s32 4294967294, %s1744_s23   ;;  %p62_p0 = scmp.ne.s32.totalorder %s1728_s19, %s1724_s18 }
   0xf   : > { %p2186_p1 = scmp.eq.s32.totalorder %s1816_s24, 0  ;;  %p164_p3 = scmp.eq.s32.totalorder %s1116_s25, 1 }
  0x10   : > { %p1117_p5 = scmp.ge.s32.totalorder %s1744_s23, 1  ;;  %p199_p7 = scmp.lt.s32.totalorder %s1744_s23, 3 }
  0x11   : > { %p1825_p4 = por %p2186_p1, %p62_p0  ;;  %p1830_p6 = por %p164_p3, %p62_p0 }
  0x12   : > { %p1835_p8 = pnand %p1117_p5, %p199_p7  ;;  %s1746_s29 = smov [#allocation7]  }
  0x13   : > { %s2198_s26 = scalar_select %p1825_p4, 1, 0 }
  0x14   : > { %s2199_s27 = scalar_select %p1830_p6, 1, 0 }
  0x15   : > { %s2200_s28 = scalar_select %p1835_p8, 1, 0 }
  0x16   : > { %s211_s30 = sshll.u32 %s1746_s29, 4  ;;  %p1435_p9 = pneg %p1835_p8  ;;  %s212_s30 = int_to_ptr.vmem [resolvable:$true] %s211_s30 }
  0x17   : > { %s40_s7 = sadd.s32 1, %s1740_s22  ;;  %s2202_s2 = sld [smem:[#allocation19_spill]] }
  0x18   : > { %p1844_p11 = pnand %p1435_p9, %p2186_p1 }
  0x1a   : > { %p1536_p13 = pneg %p1844_p11 }
  0x1d   : > { %s1534_s10 = scalar_lea.hbm %s2202_s2, 1024 }
  0x1e   : > { %p1535_p12 = scmp.ne.s32.totalorder %s2202_s2, %s1534_s10  ;;  %p1541_p5 = scmp.lt.u32.totalorder %s1534_s10, %s2202_s2 }
  0x20   : > { %p1537_p0 = pnand %p1536_p13, %p1535_p12 }
  0x22   : > { %p1538_p3 = pneg %p1537_p0 }
  0x24   : > { %p1543_p7 = pnand %p1541_p5, %p1538_p3 }
  0x26   : > { %1546 = shalt.err (!%p1543_p7)
}
  0x27   : > { %s1547_s15 = scalar_lea.vmem %s212_s30, 1024  ;;  %p1555_p2 = scmp.lt.s32.totalorder %s212_s30, %s212_s30 }
  0x28   : > { %p1548_p9 = scmp.ne.s32.totalorder %s212_s30, %s1547_s15  ;;  %p1556_p6 = scmp.lt.s32.totalorder %s1547_s15, %s1547_s15 }
  0x2a   : > { %p1550_p10 = pnand %p1548_p9, %p1536_p13  ;;  %p1557_p4 = por %p1556_p6, %p1555_p2 }
  0x2c   : > { %p1551_p1 = pneg %p1550_p10 }
  0x2e   : > { %p1558_p8 = pnand %p1557_p4, %p1551_p1 }
  0x30   : > { %1561 = shalt.err (!%p1558_p8)
}
  0x31   : > { %s2189_s16 = smov 64   ;;  %s2191_s17 = smov 4  }
  0x32   : > { %1438 = dma.hbm_to_vmem [thread:$0]  (!%p1844_p11), %s2202_s2, 1024, %s212_s30, [#allocation6], %s2189_s16, %s2189_s16, %s2191_s17  }
  0x33   : > { %p42_p1 = scmp.ge.s32.totalorder %s40_s7, 2  ;;  %s49_s8 = sadd.s32 1, %s1732_s20 }
  0x34   : > { %p56_p2 = scmp.ne.s32.totalorder %s1732_s20, %s1728_s19  ;;  %p57_p4 = scmp.eq.s32.totalorder %s1744_s23, 0 }
  0x35   : > { %s2223_s7 = smov (%p42_p1, %s40_s7), 0  ;;  %p2205_p8 = scmp.eq.s32.totalorder %s1816_s24, 1 }
  0x36   : > { %2203 = sst [smem:[#allocation17_spill]] %s2223_s7  ;;  %p1874_p6 = por %p57_p4, %p56_p2 }
  0x37   : > { %p1880_p10 = por %p2205_p8, %p56_p2  ;;  %s44_s10 = ssub.s32 %s1740_s22, %s2223_s7 }
  0x38   : > { %p1454_p12 = scmp.lt.s32.totalorder %s1744_s23, 2  ;;  %p47_p11 = scmp.eq.s32.totalorder %s44_s10, 0 }
  0x39   : > { %s228_s30 = sand.u32 1, %s1732_s20   ;;  %s1197_s13 = sshll.u32 %s1740_s22, 10 }
  0x3a   : > { %s1120_s11 = sshll.u32 %s228_s30, 6  ;;  %s2207_s0 = sld [smem:[#allocation18_spill]] }
  0x3b   : > { %s1889_s12 = scalar_select %p47_p11, %s1732_s20, %s49_s8  }
  0x3c   : > { %s232_s29 = scalar_lea.vmem [#allocation2], %s1120_s11  ;;  %p1901_p13 = pnand %p1454_p12, %p1874_p6 }
  0x3d   : > { %s241_s16 = sshll.u32 %s232_s29, 4  ;;  %s1908_s14 = scalar_lea.hbm %s2181_s1, %s1197_s13  ;;  %s1897_s16 = int_to_ptr.vmem [resolvable:$true] %s241_s16 }
  0x3e   : > { %s255_s15 = scalar_lea.vmem [#allocation5], %s1120_s11  ;;  %s1912_s7 = scalar_lea.sflag [#allocation3], %s228_s30 }
  0x3f   : > { %s1910_s2 = sshll.u32 %s255_s15, 4  ;;  %p1564_p3 = pneg %p1901_p13  ;;  %s1944_s2 = int_to_ptr.vmem [resolvable:$true] %s1910_s2 }
  0x40   : > { %s1895_s25 = scalar_lea.hbm %s2207_s0, %s1197_s13  ;;  %s1567_s17 = scalar_lea.hbm %s2207_s0, 2048 }
  0x41   : > { %s1562_s29 = scalar_lea.hbm %s1895_s25, 1024  ;;  %p1568_p9 = scmp.lt.u32.totalorder %s1895_s25, %s2207_s0 }
  0x42   : > { %p1563_p0 = scmp.ne.s32.totalorder %s1895_s25, %s1562_s29  ;;  %p1569_p1 = scmp.lt.u32.totalorder %s1567_s17, %s1562_s29 }
  0x43   : > { %p1571_p4 = scmp.lt.u32.totalorder %s1562_s29, %s1895_s25 }
  0x44   : > { %p1565_p5 = pnand %p1564_p3, %p1563_p0  ;;  %p1570_p2 = por %p1569_p1, %p1568_p9 }
  0x46   : > { %p1566_p7 = pneg %p1565_p5  ;;  %p1572_p6 = por %p1571_p4, %p1570_p2 }
  0x48   : > { %p1573_p8 = pnand %p1572_p6, %p1566_p7 }
  0x4a   : > { %1576 = shalt.err (!%p1573_p8)
}
  0x4b   : > { %s1577_s30 = scalar_lea.vmem %s1897_s16, 1024  ;;  %s1749_s22 = smov [#allocation2]  }
  0x4c   : > { %p1578_p12 = scmp.ne.s32.totalorder %s1897_s16, %s1577_s30  ;;  %s1582_s11 = sshll.u32 %s1749_s22, 4  ;;  %s1583_s11 = int_to_ptr.vmem [resolvable:$false] %s1582_s11 }
  0x4d   : > { %s1584_s15 = scalar_lea.vmem %s1583_s11, 2048  ;;  %p1585_p5 = scmp.lt.s32.totalorder %s1897_s16, %s1583_s11 }
  0x4e   : > { %p1580_p11 = pnand %p1578_p12, %p1564_p3  ;;  %p1586_p9 = scmp.lt.s32.totalorder %s1584_s15, %s1577_s30 }
  0x50   : > { %p1581_p0 = pneg %p1580_p11  ;;  %p1587_p1 = por %p1586_p9, %p1585_p5 }
  0x52   : > { %p1588_p2 = pnand %p1587_p1, %p1581_p0 }
  0x54   : > { %1591 = shalt.err (!%p1588_p2)
}
  0x55   : > { %s2209_s29 = smov 4   ;;  %s2210_s9 = smov 64  }
  0x56   : > { %1442 = dma.hbm_to_vmem [thread:$0]  (!%p1901_p13), %s1895_s25, 1024, %s1897_s16, %s1912_s7, %s2210_s9, %s2210_s9, %s2209_s29  }
  0x57   : > { %s251_s17 = sand.u32 1, %s1744_s23   ;;  %s1592_s13 = scalar_lea.hbm %s1908_s14, 1024 }
  0x58   : > { %s1947_s8 = scalar_lea.sflag [#allocation6], %s251_s17  ;;  %p1593_p7 = scmp.ne.s32.totalorder %s1908_s14, %s1592_s13 }
  0x59   : > { %s1597_s11 = scalar_lea.hbm %s2181_s1, 2048  ;;  %p1598_p8 = scmp.lt.u32.totalorder %s1908_s14, %s2181_s1 }
  0x5a   : > { %p1595_p4 = pnand %p1593_p7, %p1564_p3  ;;  %p1599_p12 = scmp.lt.u32.totalorder %s1597_s11, %s1592_s13 }
  0x5b   : > { %p1601_p0 = scmp.lt.u32.totalorder %s1592_s13, %s1908_s14 }
  0x5c   : > { %p1596_p6 = pneg %p1595_p4  ;;  %p1600_p11 = por %p1599_p12, %p1598_p8 }
  0x5e   : > { %p1602_p5 = por %p1601_p0, %p1600_p11 }
  0x60   : > { %p1603_p9 = pnand %p1602_p5, %p1596_p6 }
  0x62   : > { %1606 = shalt.err (!%p1603_p9)
}
  0x63   : > { %s1607_s7 = scalar_lea.vmem %s1944_s2, 1024  ;;  %s1750_s16 = smov [#allocation5]  }
  0x64   : > { %p1608_p1 = scmp.ne.s32.totalorder %s1944_s2, %s1607_s7  ;;  %s1612_s25 = sshll.u32 %s1750_s16, 4  ;;  %s1613_s25 = int_to_ptr.vmem [resolvable:$false] %s1612_s25 }
  0x65   : > { %s1614_s0 = scalar_lea.vmem %s1613_s25, 2048  ;;  %p1615_p4 = scmp.lt.s32.totalorder %s1944_s2, %s1613_s25 }
  0x66   : > { %p1610_p2 = pnand %p1608_p1, %p1564_p3  ;;  %p1616_p8 = scmp.lt.s32.totalorder %s1614_s0, %s1607_s7 }
  0x68   : > { %p1611_p7 = pneg %p1610_p2  ;;  %p1617_p12 = por %p1616_p8, %p1615_p4 }
  0x6a   : > { %p1618_p11 = pnand %p1617_p12, %p1611_p7 }
  0x6c   : > { %1621 = shalt.err (!%p1618_p11)
}
  0x6d   : > { %1445 = dma.hbm_to_vmem [thread:$0]  (!%p1901_p13), %s1908_s14, 1024, %s1944_s2, %s1947_s8, %s2210_s9, %s2210_s9, %s2209_s29  }
  0x6e   : > { %p2211_p3 = scmp.ne.s32.totalorder %s2200_s28, 0 }
  0x6f   : > { %s1979_s17 = sand.u32 (!%p2211_p3), 1, %s1728_s19   ;;  %p2212_p6 = scmp.ne.s32.totalorder (!%p2211_p3), %s2198_s26, 0 }
  0x70   : > { %276 = sbr.rel (%p2211_p3) target bundleno = 579 (0x243), region = 36  ;;  %s1982_s13 = sshll.u32 (!%p2211_p3), %s1979_s17, 6 }
  0x71   : > { %s279_s10 = scalar_lea.sflag (!%p2211_p3), [#allocation3], %s1979_s17  ;;  %s1986_s30 = scalar_lea.vmem (!%p2211_p3), [#allocation2], %s1982_s13 }
  0x77   : > { %1703 = dma.done.wait (%p2212_p6), %s279_s10, 1024  }
  0x78   : > { %1705 = vsyncadd (%p2212_p6), %s279_s10, 4294966272  ;;  %s287_s2 = sand.u32 1, %s1816_s24   ;;  %s1994_s14 = scalar_lea.vmem [#allocation5], %s1982_s13 }
  0x79   : > { %s288_s28 = scalar_lea.sflag [#allocation6], %s287_s2 }
  0x7a   : > { %1707 = dma.done.wait (%p2212_p6), %s288_s28, 1024  }
  0x7b   : > { %1709 = vsyncadd (%p2212_p6), %s288_s28, 4294966272  ;;  %p2213_p13 = scmp.eq.s32.totalorder %s1816_s24, 0 }
  0x7d   : > { %1711 = dma.done.wait (%p2213_p13), [#allocation6], 1024   ;;  %p2214_p0 = pmov %p2213_p13 }
  0x7e   : > { %v1510_v0 = vld [vmem:[#allocation7] sm:$0xff]   ;;  %v1511_v1 = vld [vmem:[#allocation7 + $0x8] sm:$0xff]   ;;  %v1512_v2 = vld [vmem:[#allocation7 + $0x10] sm:$0xff]   ;;  %s2042_s29 = scalar_lea.vmem [#allocation9], %s1982_s13  ;;  %s1231_s8 = sshll.u32 %s1736_s21, 10 }
  0x7f   : > { %1713 = vsyncadd (%p2214_p0), [#allocation6], 4294966272  ;;  %1359 = vmatprep.subr.bf16.mxu0 %v1510_v0  ;;  %1391 = vmatprep.subr.bf16.mxu1 %v1510_v0  ;;  %v1513_v3 = vld [vmem:[#allocation7 + $0x18] sm:$0xff]   ;;  %v1518_v4 = vld [vmem:[%s1986_s30] sm:$0xff]   ;;  %s959_s9 = sshll.u32 %s2042_s29, 4  ;;  %s2080_s15 = scalar_lea.hbm %s2185_s5, %s1231_s8  ;;  %s2073_s9 = int_to_ptr.vmem [resolvable:$true] %s959_s9 }
  0x80   : > { %1360 = vmatpush3.bf16.msra.mxu0 %v1510_v0  ;;  %1392 = vmatpush3.bf16.msra.mxu1 %v1510_v0  ;;  %v1514_v5 = vld [vmem:[#allocation7 + $0x20] sm:$0xff]   ;;  %v1515_v6 = vld [vmem:[#allocation7 + $0x28] sm:$0xff]   ;;  %v1516_v8 = vld [vmem:[#allocation7 + $0x30] sm:$0xff]   ;;  %s927_s7 = scalar_lea.sflag [#allocation10], %s1979_s17  ;;  %s1622_s16 = scalar_lea.vmem %s2073_s9, 1024 }
  0x81   : > { %1361 = vmatprep.subr.bf16.mxu0 %v1511_v1  ;;  %1393 = vmatprep.subr.bf16.mxu1 %v1511_v1  ;;  %v1526_v7 = vld [vmem:[%s1994_s14] sm:$0xff]   ;;  %v1517_v9 = vld [vmem:[#allocation7 + $0x38] sm:$0xff]   ;;  %v1519_v10 = vld [vmem:[%s1986_s30 + $0x8] sm:$0xff]   ;;  %p1623_p5 = scmp.ne.s32.totalorder %s2073_s9, %s1622_s16  ;;  %s1751_s25 = smov [#allocation9]  }
  0x82   : > { %1375 = vmatprep.mubr.bf16.mxu0 %v1518_v4  ;;  %1407 = vmatprep.mubr.bf16.mxu1 %v1526_v7  ;;  %v1527_v11 = vld [vmem:[%s1994_s14 + $0x8] sm:$0xff]   ;;  %v1520_v12 = vld [vmem:[%s1986_s30 + $0x10] sm:$0xff]   ;;  %v1521_v14 = vld [vmem:[%s1986_s30 + $0x18] sm:$0xff]   ;;  %s1626_s0 = sshll.u32 %s1751_s25, 4  ;;  %s1627_s0 = int_to_ptr.vmem [resolvable:$false] %s1626_s0 }
  0x83   : > { %v1528_v13 = vld [vmem:[%s1994_s14 + $0x10] sm:$0xff]   ;;  %v1529_v15 = vld [vmem:[%s1994_s14 + $0x18] sm:$0xff]   ;;  %v1522_v16 = vld [vmem:[%s1986_s30 + $0x20] sm:$0xff]   ;;  %p1624_p9 = pnand %p1623_p5, %p1880_p10  ;;  %s1628_s10 = scalar_lea.vmem %s1627_s0, 2048 }
  0x84   : > { %1362 = vmatpush3.bf16.msra.mxu0 %v1511_v1  ;;  %1394 = vmatpush3.bf16.msra.mxu1 %v1511_v1  ;;  %v1530_v17 = vld [vmem:[%s1994_s14 + $0x20] sm:$0xff]   ;;  %v1523_v18 = vld [vmem:[%s1986_s30 + $0x28] sm:$0xff]   ;;  %v1524_v20 = vld [vmem:[%s1986_s30 + $0x30] sm:$0xff]   ;;  %p1629_p2 = scmp.lt.s32.totalorder %s2073_s9, %s1627_s0  ;;  %p1630_p7 = scmp.lt.s32.totalorder %s1628_s10, %s1622_s16 }
  0x85   : > { %1363 = vmatprep.subr.bf16.mxu0 %v1512_v2  ;;  %1395 = vmatprep.subr.bf16.mxu1 %v1512_v2  ;;  %v1531_v19 = vld [vmem:[%s1994_s14 + $0x28] sm:$0xff]   ;;  %v1532_v21 = vld [vmem:[%s1994_s14 + $0x30] sm:$0xff]   ;;  %v1525_v22 = vld [vmem:[%s1986_s30 + $0x38] sm:$0xff]   ;;  %p1625_p1 = pneg %p1624_p9 }
  0x86   : > { %v1533_v23 = vld [vmem:[%s1994_s14 + $0x38] sm:$0xff]   ;;  %v2023_v24 = vld [vmem:[%s2183_s3] ss:$0 sm:$0xff]  ;;  %p1631_p4 = por %p1630_p7, %p1629_p2 }
  0x88   : > { %1364 = vmatpush3.bf16.msra.mxu0 %v1512_v2  ;;  %1396 = vmatpush3.bf16.msra.mxu1 %v1512_v2  ;;  %p1632_p8 = pnand %p1631_p4, %p1625_p1 }
  0x89   : > { %1365 = vmatprep.subr.bf16.mxu0 %v1513_v3  ;;  %1397 = vmatprep.subr.bf16.mxu1 %v1513_v3 }
  0x8c   : > { %1366 = vmatpush3.bf16.msra.mxu0 %v1513_v3  ;;  %1398 = vmatpush3.bf16.msra.mxu1 %v1513_v3 }
  0x8d   : > { %1367 = vmatprep.subr.bf16.mxu0 %v1514_v5  ;;  %1399 = vmatprep.subr.bf16.mxu1 %v1514_v5 }
  0x90   : > { %1368 = vmatpush3.bf16.msra.mxu0 %v1514_v5  ;;  %1400 = vmatpush3.bf16.msra.mxu1 %v1514_v5 }
  0x91   : > { %1369 = vmatprep.subr.bf16.mxu0 %v1515_v6  ;;  %1401 = vmatprep.subr.bf16.mxu1 %v1515_v6 }
  0x94   : > { %1370 = vmatpush3.bf16.msra.mxu0 %v1515_v6  ;;  %1402 = vmatpush3.bf16.msra.mxu1 %v1515_v6 }
  0x95   : > { %1371 = vmatprep.subr.bf16.mxu0 %v1516_v8  ;;  %1403 = vmatprep.subr.bf16.mxu1 %v1516_v8 }
  0x98   : > { %1372 = vmatpush3.bf16.msra.mxu0 %v1516_v8  ;;  %1404 = vmatpush3.bf16.msra.mxu1 %v1516_v8 }
  0x99   : > { %1373 = vmatprep.subr.bf16.mxu0 %v1517_v9  ;;  %1405 = vmatprep.subr.bf16.mxu1 %v1517_v9 }
  0x9c   : > { %1374 = vmatpush3.bf16.msra.mxu0 %v1517_v9  ;;  %1406 = vmatpush3.bf16.msra.mxu1 %v1517_v9 }
  0x9f   : > { %1376 = vmatmul.mubr.bf16.vlgmr.msra.gmra.mrb[0].mxu0 %v1519_v10  ;;  %1408 = vmatmul.mubr.bf16.vlgmr.msra.gmra.mrb[0].mxu1 %v1527_v11 }
  0xa0   : > { %1379 = vmatprep.mubr.bf16.mxu0 %v1520_v12  ;;  %1411 = vmatprep.mubr.bf16.mxu1 %v1528_v13 }
  0xa7   : > { %1380 = vmatmul.mubr.bf16.gmra.mrb[4].mxu0 %v1521_v14  ;;  %1412 = vmatmul.mubr.bf16.gmra.mrb[4].mxu1 %v1529_v15 }
  0xa8   : > { %1383 = vmatprep.mubr.bf16.mxu0 %v1522_v16  ;;  %1415 = vmatprep.mubr.bf16.mxu1 %v1530_v17 }
  0xaf   : > { %1384 = vmatmul.mubr.bf16.gmra.mrb[8].mxu0 %v1523_v18  ;;  %1416 = vmatmul.mubr.bf16.gmra.mrb[8].mxu1 %v1531_v19 }
  0xb0   : > { %1387 = vmatprep.mubr.bf16.mxu0 %v1524_v20  ;;  %1419 = vmatprep.mubr.bf16.mxu1 %v1532_v21 }
  0xb7   : > { %1388 = vmatmul.mubr.bf16.gmra.mrb[12].mxu0 %v1525_v22  ;;  %1420 = vmatmul.mubr.bf16.gmra.mrb[12].mxu1 %v1533_v23 }
 0x172   : > { %v1377_v25 = vpop.f32.mrb[0].mxu0  ;;  %v1409_v48 = vpop.f32.mrb[0].mxu1 }
 0x173   : > { %v505_v26 = vpop.f32.mrb[1].mxu0  ;;  %v514_v33 = vadd.f32 %v1377_v25, %v2023_v24  ;;  %v675_v51 = vadd.f32 %v1409_v48, %v2023_v24  ;;  %v666_v52 = vpop.f32.mrb[1].mxu1 }
 0x174   : > { %v1378_v27 = vpop.f32.mrb[2].mxu0  ;;  %v506_v28 = vadd.f32 %v2023_v24, %v505_v26  ;;  %v1410_v53 = vpop.f32.mrb[2].mxu1  ;;  %v667_v54 = vadd.f32 %v2023_v24, %v666_v52 }
 0x175   : > { %v508_v29 = vpop.f32.mrb[3].mxu0  ;;  %v517_v36 = vadd.f32 %v1378_v27, %v2023_v24  ;;  %v678_v55 = vadd.f32 %v1410_v53, %v2023_v24  ;;  %v669_v56 = vpop.f32.mrb[3].mxu1 }
 0x176   : > { %729 = vxpose.xlu0.b32.start [1/16] %v506_v28, 128  ;;  %v509_v30 = vadd.f32 %v2023_v24, %v508_v29  ;;  %v670_v57 = vadd.f32 %v2023_v24, %v669_v56 }
 0x177   : > { %v1281_v59 = vpack.c.bf16 %v678_v55, %v675_v51 }
 0x178   : > { %v1276_v61 = vpack.c.bf16 %v670_v57, %v667_v54 }
 0x179   : > { %1320 = vst [vmem:[%s2042_s29 + $0x8] sm:$0xff] %v1281_v59  }
 0x17a   : > { %730 = vxpose.xlu0.b32.cont [2/16] %v509_v30, 128  ;;  %v1381_v31 = vpop.f32.mrb[4].mxu0  ;;  %v1413_v58 = vpop.f32.mrb[4].mxu1  ;;  %1277 = vst [vmem:[%s2042_s29] sm:$0xff] %v1276_v61  }
 0x17b   : > { %v521_v32 = vpop.f32.mrb[5].mxu0  ;;  %v530_v45 = vadd.f32 %v1381_v31, %v2023_v24  ;;  %v691_v62 = vadd.f32 %v1413_v58, %v2023_v24  ;;  %v682_v63 = vpop.f32.mrb[5].mxu1 }
 0x17c   : > { %v1382_v34 = vpop.f32.mrb[6].mxu0  ;;  %v522_v37 = vadd.f32 %v2023_v24, %v521_v32  ;;  %v1414_v1 = vpop.f32.mrb[6].mxu1  ;;  %v683_v2 = vadd.f32 %v2023_v24, %v682_v63 }
 0x17d   : > { %v524_v35 = vpop.f32.mrb[7].mxu0  ;;  %v533_v49 = vadd.f32 %v1382_v34, %v2023_v24  ;;  %v694_v3 = vadd.f32 %v1414_v1, %v2023_v24  ;;  %v685_v4 = vpop.f32.mrb[7].mxu1 }
 0x17e   : > { %731 = vxpose.xlu0.b32.cont [3/16] %v514_v33, 128  ;;  %v525_v42 = vadd.f32 %v2023_v24, %v524_v35  ;;  %v686_v5 = vadd.f32 %v2023_v24, %v685_v4 }
 0x17f   : > { %v1291_v7 = vpack.c.bf16 %v694_v3, %v691_v62 }
 0x180   : > { %v1286_v9 = vpack.c.bf16 %v686_v5, %v683_v2 }
 0x181   : > { %1322 = vst [vmem:[%s2042_s29 + $0x18] sm:$0xff] %v1291_v7  }
 0x182   : > { %732 = vxpose.xlu0.b32.cont [4/16] %v517_v36, 128  ;;  %v1385_v38 = vpop.f32.mrb[8].mxu0  ;;  %v1417_v6 = vpop.f32.mrb[8].mxu1  ;;  %1321 = vst [vmem:[%s2042_s29 + $0x10] sm:$0xff] %v1286_v9  }
 0x183   : > { %v537_v39 = vpop.f32.mrb[9].mxu0  ;;  %v546_v0 = vadd.f32 %v1385_v38, %v2023_v24  ;;  %v707_v11 = vadd.f32 %v1417_v6, %v2023_v24  ;;  %v698_v12 = vpop.f32.mrb[9].mxu1 }
 0x184   : > { %v1386_v40 = vpop.f32.mrb[10].mxu0  ;;  %v538_v50 = vadd.f32 %v2023_v24, %v537_v39  ;;  %v1418_v13 = vpop.f32.mrb[10].mxu1  ;;  %v699_v14 = vadd.f32 %v2023_v24, %v698_v12 }
 0x185   : > { %v540_v41 = vpop.f32.mrb[11].mxu0  ;;  %v549_v8 = vadd.f32 %v1386_v40, %v2023_v24  ;;  %v710_v15 = vadd.f32 %v1418_v13, %v2023_v24  ;;  %v701_v16 = vpop.f32.mrb[11].mxu1 }
 0x186   : > { %733 = vxpose.xlu0.b32.cont [5/16] %v522_v37, 128  ;;  %v541_v60 = vadd.f32 %v2023_v24, %v540_v41  ;;  %v702_v17 = vadd.f32 %v2023_v24, %v701_v16 }
 0x187   : > { %v1301_v19 = vpack.c.bf16 %v710_v15, %v707_v11 }
 0x188   : > { %v1296_v21 = vpack.c.bf16 %v702_v17, %v699_v14 }
 0x189   : > { %1324 = vst [vmem:[%s2042_s29 + $0x28] sm:$0xff] %v1301_v19  }
 0x18a   : > { %734 = vxpose.xlu0.b32.cont [6/16] %v525_v42, 128  ;;  %v1389_v43 = vpop.f32.mrb[12].mxu0  ;;  %v1421_v18 = vpop.f32.mrb[12].mxu1  ;;  %1323 = vst [vmem:[%s2042_s29 + $0x20] sm:$0xff] %v1296_v21  }
 0x18b   : > { %v553_v44 = vpop.f32.mrb[13].mxu0  ;;  %v723_v22 = vadd.f32 %v1421_v18, %v2023_v24  ;;  %v714_v23 = vpop.f32.mrb[13].mxu1  ;;  %v562_v25 = vadd.f32 %v1389_v43, %v2023_v24 }
 0x18c   : > { %v2032_v46 = vpop.f32.mrb[14].mxu0  ;;  %v554_v10 = vadd.f32 %v2023_v24, %v553_v44  ;;  %v1422_v26 = vpop.f32.mrb[14].mxu1  ;;  %v715_v27 = vadd.f32 %v2023_v24, %v714_v23 }
 0x18d   : > { %v556_v47 = vpop.f32.mrb[15].mxu0  ;;  %v726_v28 = vadd.f32 %v1422_v26, %v2023_v24  ;;  %v717_v29 = vpop.f32.mrb[15].mxu1  ;;  %v565_v32 = vadd.f32 %v2032_v46, %v2023_v24 }
 0x18e   : > { %735 = vxpose.xlu0.b32.cont [7/16] %v530_v45, 128  ;;  %v557_v20 = vadd.f32 %v2023_v24, %v556_v47  ;;  %v718_v30 = vadd.f32 %v2023_v24, %v717_v29 }
 0x18f   : > { %v1311_v31 = vpack.c.bf16 %v726_v28, %v723_v22 }
 0x190   : > { %v1306_v33 = vpack.c.bf16 %v718_v30, %v715_v27 }
 0x191   : > { %1326 = vst [vmem:[%s2042_s29 + $0x38] sm:$0xff] %v1311_v31  }
 0x192   : > { %736 = vxpose.xlu0.b32.cont [8/16] %v533_v49, 128  ;;  %1325 = vst [vmem:[%s2042_s29 + $0x30] sm:$0xff] %v1306_v33  }
 0x196   : > { %737 = vxpose.xlu0.b32.cont [9/16] %v538_v50, 128 }
 0x19a   : > { %738 = vxpose.xlu0.b32.cont [10/16] %v541_v60, 128 }
 0x19e   : > { %739 = vxpose.xlu0.b32.cont [11/16] %v546_v0, 128 }
 0x1a2   : > { %740 = vxpose.xlu0.b32.cont [12/16] %v549_v8, 128 }
 0x1a6   : > { %741 = vxpose.xlu0.b32.cont [13/16] %v554_v10, 128 }
 0x1aa   : > { %742 = vxpose.xlu0.b32.cont [14/16] %v557_v20, 128 }
 0x1ae   : > { %743 = vxpose.xlu0.b32.cont [15/16] %v562_v25, 128 }
 0x1b2   : > { %744 = vxpose.xlu0.b32.end [16/16] %v565_v32, 128 }
 0x1b3   : > { %1635 = shalt.err (!%p1632_p8)
}
 0x1b4   : > { %s1636_s30 = scalar_lea.hbm %s2080_s15, 1024  ;;  %s1640_s14 = scalar_lea.hbm %s2185_s5, 2048 }
 0x1b5   : > { %p1637_p12 = scmp.ne.s32.totalorder %s2080_s15, %s1636_s30  ;;  %p1641_p6 = scmp.lt.u32.totalorder %s2080_s15, %s2185_s5 }
 0x1b6   : > { %p1642_p13 = scmp.lt.u32.totalorder %s1640_s14, %s1636_s30  ;;  %p1644_p5 = scmp.lt.u32.totalorder %s1636_s30, %s2080_s15 }
 0x1b7   : > { %p1638_p11 = pnand %p1637_p12, %p1880_p10 }
 0x1b8   : > { %p1643_p0 = por %p1642_p13, %p1641_p6 }
 0x1b9   : > { %p1639_p3 = pneg %p1638_p11 }
 0x1ba   : > { %p1645_p9 = por %p1644_p5, %p1643_p0 }
 0x1bc   : > { %p1646_p1 = pnand %p1645_p9, %p1639_p3 }
 0x1be   : > { %1649 = shalt.err (!%p1646_p1)
}
 0x1bf   : > { %s1752_s29 = smov 64   ;;  %s1753_s22 = smov 4  }
 0x1c0   : > { %1432 = dma.vmem_to_hbm [thread:$0]  (%p1880_p10), %s2073_s9, 1024, %s2080_s15, %s927_s7, %s1752_s29, %s1752_s29, %s1753_s22  }
 0x1c1   : > { %s2110_s11 = scalar_lea.vmem [#allocation8], %s1982_s13  ;;  %s2127_s7 = scalar_lea.hbm %s2184_s4, %s1231_s8 }
 0x1c2   : > { %s941_s13 = sshll.u32 %s2110_s11, 4  ;;  %s922_s16 = scalar_lea.sflag [#allocation4], %s1979_s17  ;;  %s2120_s13 = int_to_ptr.vmem [resolvable:$true] %s941_s13 }
 0x1c3   : > { %s1650_s25 = scalar_lea.vmem %s2120_s13, 1024  ;;  %s1754_s0 = smov [#allocation8]  }
 0x1c4   : > { %p1651_p2 = scmp.ne.s32.totalorder %s2120_s13, %s1650_s25  ;;  %s1654_s10 = sshll.u32 %s1754_s0, 4  ;;  %s1655_s10 = int_to_ptr.vmem [resolvable:$false] %s1654_s10 }
 0x1c5   : > { %s1656_s30 = scalar_lea.vmem %s1655_s10, 2048  ;;  %p1657_p8 = scmp.lt.s32.totalorder %s2120_s13, %s1655_s10 }
 0x1c6   : > { %p1652_p7 = pnand %p1651_p2, %p1880_p10  ;;  %p1658_p12 = scmp.lt.s32.totalorder %s1656_s30, %s1650_s25 }
 0x1c8   : > { %p1653_p4 = pneg %p1652_p7  ;;  %p1659_p11 = por %p1658_p12, %p1657_p8 }
 0x1ca   : > { %p1660_p3 = pnand %p1659_p11, %p1653_p4 }
 0x1f6   : > { %v745_v24 = vpop.trf.xlu0 }
 0x1fa   : > { %v746_v34 = vpop.trf.xlu0 }
 0x1fb   : > { %v1236_v35 = vpack.c.bf16 %v746_v34, %v745_v24 }
 0x1fd   : > { %1237 = vst [vmem:[%s2110_s11] sm:$0xff] %v1236_v35  }
 0x1fe   : > { %v747_v36 = vpop.trf.xlu0 }
 0x202   : > { %v748_v37 = vpop.trf.xlu0 }
 0x203   : > { %v1241_v38 = vpack.c.bf16 %v748_v37, %v747_v36 }
 0x205   : > { %1313 = vst [vmem:[%s2110_s11 + $0x8] sm:$0xff] %v1241_v38  }
 0x206   : > { %v749_v39 = vpop.trf.xlu0 }
 0x20a   : > { %v750_v40 = vpop.trf.xlu0 }
 0x20b   : > { %v1246_v41 = vpack.c.bf16 %v750_v40, %v749_v39 }
 0x20d   : > { %1314 = vst [vmem:[%s2110_s11 + $0x10] sm:$0xff] %v1246_v41  }
 0x20e   : > { %v751_v42 = vpop.trf.xlu0 }
 0x212   : > { %v752_v43 = vpop.trf.xlu0 }
 0x213   : > { %v1251_v44 = vpack.c.bf16 %v752_v43, %v751_v42 }
 0x215   : > { %1315 = vst [vmem:[%s2110_s11 + $0x18] sm:$0xff] %v1251_v44  }
 0x216   : > { %v753_v45 = vpop.trf.xlu0 }
 0x21a   : > { %v754_v46 = vpop.trf.xlu0 }
 0x21b   : > { %v1256_v47 = vpack.c.bf16 %v754_v46, %v753_v45 }
 0x21d   : > { %1316 = vst [vmem:[%s2110_s11 + $0x20] sm:$0xff] %v1256_v47  }
 0x21e   : > { %v755_v48 = vpop.trf.xlu0 }
 0x222   : > { %v756_v49 = vpop.trf.xlu0 }
 0x223   : > { %v1261_v50 = vpack.c.bf16 %v756_v49, %v755_v48 }
 0x225   : > { %1317 = vst [vmem:[%s2110_s11 + $0x28] sm:$0xff] %v1261_v50  }
 0x226   : > { %v757_v51 = vpop.trf.xlu0 }
 0x22a   : > { %v758_v52 = vpop.trf.xlu0 }
 0x22b   : > { %v1266_v53 = vpack.c.bf16 %v758_v52, %v757_v51 }
 0x22d   : > { %1318 = vst [vmem:[%s2110_s11 + $0x30] sm:$0xff] %v1266_v53  }
 0x22e   : > { %v759_v54 = vpop.trf.xlu0 }
 0x232   : > { %v760_v55 = vpop.trf.xlu0 }
 0x233   : > { %v1271_v56 = vpack.c.bf16 %v760_v55, %v759_v54 }
 0x235   : > { %1319 = vst [vmem:[%s2110_s11 + $0x38] sm:$0xff] %v1271_v56  }
 0x236   : > { %1663 = shalt.err (!%p1660_p3)
}
 0x237   : > { %s1664_s21 = scalar_lea.hbm %s2127_s7, 1024  ;;  %s1668_s28 = scalar_lea.hbm %s2184_s4, 2048 }
 0x238   : > { %p1665_p6 = scmp.ne.s32.totalorder %s2127_s7, %s1664_s21  ;;  %p1669_p5 = scmp.lt.u32.totalorder %s2127_s7, %s2184_s4 }
 0x239   : > { %p1670_p9 = scmp.lt.u32.totalorder %s1668_s28, %s1664_s21  ;;  %p1672_p2 = scmp.lt.u32.totalorder %s1664_s21, %s2127_s7 }
 0x23a   : > { %p1666_p13 = pnand %p1665_p6, %p1880_p10 }
 0x23b   : > { %p1671_p1 = por %p1670_p9, %p1669_p5 }
 0x23c   : > { %p1667_p0 = pneg %p1666_p13 }
 0x23d   : > { %p1673_p7 = por %p1672_p2, %p1671_p1 }
 0x23f   : > { %p1674_p4 = pnand %p1673_p7, %p1667_p0 }
 0x241   : > { %1677 = shalt.err (!%p1674_p4)
}
 0x242   : > { %1431 = dma.vmem_to_hbm [thread:$0]  (%p1880_p10), %s2120_s13, 1024, %s2127_s7, %s922_s16, %s1752_s29, %s1752_s29, %s1753_s22  }
 0x243 PF: > { %s974_s26 = sand.u32 1, %s1724_s18   ;;  %p2215_p8 = scmp.ne.s32.totalorder %s2199_s27, 0 }
 0x244   : > { %p2216_p12 = scmp.ge.s32.totalorder %s1744_s23, 2  ;;  %s975_s11 = scalar_lea.sflag [#allocation4], %s974_s26 }
 0x246   : > { %p1447_p11 = pnand %p2216_p12, %p2215_p8 }
 0x248   : > { %1715 = dma.done.wait (!%p1447_p11), %s975_s11, 1024  }
 0x249   : > { %1717 = vsyncadd (!%p1447_p11), %s975_s11, 4294966272  ;;  %s984_s6 = scalar_lea.sflag [#allocation10], %s974_s26 }
 0x24a   : > { %1719 = dma.done.wait (!%p1447_p11), %s984_s6, 1024  }
 0x24b   : > { %1721 = vsyncadd (!%p1447_p11), %s984_s6, 4294966272  ;;  %s28_s23 = sadd.s32 1, %s1744_s23   ;;  %s2217_s21 = sld [smem:[#allocation16_spill]] }
 0x24c   : > { %p25_p3 = scmp.ge.s32.totalorder %s28_s23, 4   ;;  %s2218_s22 = sld [smem:[#allocation17_spill]] }
 0x24d   : > { %s2219_s18 = smov %s1728_s19  ;;  %s2220_s19 = smov %s1732_s20 }
 0x24e   : > { %s2221_s20 = smov %s1889_s12  ;;  %27 = sbr.rel (!%p25_p3) target bundleno = 13 (0xd), region = 115 }
 0x255   :  { %989 = vsyncpa [#allocation3], 1 }
 0x256   :  { %991 = vsyncpa [#allocation3 + $0x1], 1 }
 0x257   :  { %992 = vsyncpa [#allocation6], 1 }
 0x258   :  { %994 = vsyncpa [#allocation6 + $0x1], 1 }
 0x259   :  { %995 = vsyncpa [#allocation4], 1 }
 0x25a   :  { %997 = vsyncpa [#allocation4 + $0x1], 1 }
 0x25b   :  { %998 = vsyncpa [#allocation10], 1 }
 0x25c   :  { %1000 = vsyncpa [#allocation10 + $0x1], 1 }

</bundles_post_ra>
